<compile_context>
chip_gen: v7x
topology: tpu7x:2x2x1
jax: 0.10.0
libtpu: 0.0.40
codegen_flags: <defaults>
</compile_context>

<pallas_src>
import functools

import jax
import jax.numpy as jnp
from jax.experimental import pallas as pl
from jax.experimental.pallas import tpu as pltpu

H1, H2 = 200, 300        # true hidden sizes (PyTorch module)
H1P, H2P = 256, 384      # zero-padded hidden sizes (multiples of 128 lanes)


def mlp_kernel(x_ref, w1_ref, b1_ref, w2_ref, b2_ref, w3_ref, b3_ref, o_ref,
               *, compute_dtype):
    cd = compute_dtype
    x = x_ref[...].astype(cd)                                     # (TM, 1)
    # Linear(1,200) + tanh : VPU broadcast multiply-add + EUP tanh (no MXU).
    h1 = jnp.tanh(x * w1_ref[...] + b1_ref[...])                  # (TM, H1P) cd
    # Linear(200,300) : MXU matmul, bf16 operands, f32 accumulation.
    h2 = jnp.dot(h1.astype(jnp.bfloat16), w2_ref[...],
                 preferred_element_type=jnp.float32)              # (TM, H2P) f32
    h2 = jnp.maximum(h2.astype(cd) + b2_ref[...], 0.0)            # bias + relu in cd
    # Linear(300,1) : VPU multiply; fold 128-lane slabs on the VPU, single XLU reduce.
    p = (h2 * w3_ref[...]).astype(jnp.float32)                    # (TM, H2P) f32
    npad = p.shape[-1]
    s = p[:, 0:128]
    for c in range(128, npad, 128):                               # static, vreg-aligned
        s = s + p[:, c:c + 128]                                   # (TM, 128) VPU adds
    out = jnp.sum(s, axis=-1, keepdims=True)                      # (TM, 1) one XLU reduce
    o_ref[...] = out + b3_ref[0]


def _pick_tile(n, block_rows):
    """Sublane-aligned batch tile; prefers >=2 grid steps so megacore (v7x) engages."""
    if n > block_rows:
        return block_rows
    half = -(-n // 2)                       # cdiv(n, 2)
    half_up = ((half + 7) // 8) * 8         # round up to sublane multiple
    if half_up < n:                         # splitting yields a real 2-step grid
        return half_up
    return n                                # tiny batch: single full-array tile


def linear_regression_forward(x, kp, *, block_rows=4096,
                              compute_dtype=jnp.float32, vmem_limit_bytes=None):
    """x: (N, 1) float32. kp: kernel params from prepare_params()."""
    n = x.shape[0]
    h1p = kp["w1"].shape[1]
    h2p = kp["w2"].shape[1]
    tm = _pick_tile(n, block_rows)
    grid = (pl.cdiv(n, tm),)
    const = lambda i: (0, 0)   # weights/biases stay VMEM-resident across the grid
    # NOTE: constant-index blocks are not re-DMA'd across grid steps; the default second
    # pipeline buffer (~200 KiB, mostly w2) is accepted rather than risking Buffered(1).
    kernel = functools.partial(mlp_kernel, compute_dtype=compute_dtype)

    return pl.pallas_call(
        kernel,
        out_shape=jax.ShapeDtypeStruct((n, 1), jnp.float32),
        grid=grid,
        in_specs=[
            pl.BlockSpec((tm, 1), lambda i: (i, 0)),              # x tile (pipelined)
            pl.BlockSpec((1, h1p), const),                        # w1  (1, 256)
            pl.BlockSpec((1, h1p), const),                        # b1  (1, 256)
            pl.BlockSpec((h1p, h2p), const),                      # w2  (256, 384) bf16
            pl.BlockSpec((1, h2p), const),                        # b2  (1, 384)
            pl.BlockSpec((1, h2p), const),                        # w3  (1, 384)
            pl.BlockSpec(memory_space=pltpu.MemorySpace.SMEM),    # b3  (1,) f32 scalar
        ],
        out_specs=pl.BlockSpec((tm, 1), lambda i: (i, 0)),
        compiler_params=pltpu.CompilerParams(
            dimension_semantics=("parallel",),                    # megacore on 2-TC chips
            vmem_limit_bytes=vmem_limit_bytes),
    )(x, kp["w1"], kp["b1"], kp["w2"], kp["b2"], kp["w3"], kp["b3"])


def device_defaults():
    """Per-chip tile size / compute dtype / scoped-VMEM choices from the perf review."""
    kind = jax.devices()[0].device_kind.lower()
    if "v7" in kind:     # 64 MiB physical VMEM, bf16 VPU/EUP, 2 TensorCores
        return dict(compute_dtype=jnp.bfloat16, block_rows=4096,
                    vmem_limit_bytes=48 << 20)
    if "v6" in kind:     # 128 MiB physical VMEM, bf16 VPU/EUP
        return dict(compute_dtype=jnp.bfloat16, block_rows=8192,
                    vmem_limit_bytes=64 << 20)
    if "v5" in kind:     # no bf16 VALU/EUP -> f32 elementwise; raise the 16 MiB scoped default
        return dict(compute_dtype=jnp.float32, block_rows=4096,
                    vmem_limit_bytes=64 << 20)
    # Unknown / older chips: conservative defaults.
    return dict(compute_dtype=jnp.float32, block_rows=1024, vmem_limit_bytes=None)


def init_params(key):
    """PyTorch-layout params mimicking nn.Linear's U(-1/sqrt(fan_in), 1/sqrt(fan_in))."""
    ks = jax.random.split(key, 6)

    def uniform(k, shape, fan_in):
        bound = 1.0 / jnp.sqrt(jnp.float32(fan_in))
        return jax.random.uniform(k, shape, jnp.float32, -bound, bound)

    return {
        "w1": uniform(ks[0], (H1, 1), 1),    "b1": uniform(ks[1], (H1,), 1),
        "w2": uniform(ks[2], (H2, H1), H1),  "b2": uniform(ks[3], (H2,), H1),
        "w3": uniform(ks[4], (1, H2), H2),   "b3": uniform(ks[5], (1,), H2),
    }


def prepare_params(p, compute_dtype=jnp.float32):
    """Transpose to (in, out), zero-pad hidden dims to 128-lane multiples.
    w2 goes to bf16 (MXU operand); other weights/biases to the elementwise dtype."""
    cd = compute_dtype
    f32 = jnp.float32
    w1 = jnp.zeros((1, H1P), f32).at[:, :H1].set(p["w1"].T).astype(cd)
    b1 = jnp.zeros((1, H1P), f32).at[:, :H1].set(p["b1"][None, :]).astype(cd)
    w2 = jnp.zeros((H1P, H2P), f32).at[:H1, :H2].set(p["w2"].T).astype(jnp.bfloat16)
    b2 = jnp.zeros((1, H2P), f32).at[:, :H2].set(p["b2"][None, :]).astype(cd)
    w3 = jnp.zeros((1, H2P), f32).at[:, :H2].set(p["w3"]).astype(cd)
    b3 = p["b3"].reshape(1).astype(f32)
    return {"w1": w1, "b1": b1, "w2": w2, "b2": b2, "w3": w3, "b3": b3}


def reference_forward(x, p):
    """Pure-JAX f32 reference matching the PyTorch module exactly."""
    h1 = jnp.tanh(x @ p["w1"].T + p["b1"])
    h2 = jnp.maximum(h1 @ p["w2"].T + p["b2"], 0.0)
    return h2 @ p["w3"].T + p["b3"]


if __name__ == "__main__":
    key = jax.random.PRNGKey(0)
    k_param, k_x1, k_x2 = jax.random.split(key, 3)

    cfg = device_defaults()
    params = init_params(k_param)
    kernel_params = prepare_params(params, compute_dtype=cfg["compute_dtype"])

    # Small batch: single tile, grid=(1,).
    x_small = jax.random.normal(k_x1, (8, 1), jnp.float32)
    out_small = jax.block_until_ready(
        linear_regression_forward(x_small, kernel_params, **cfg))
    ref_small = reference_forward(x_small, params)
    assert out_small.shape == (8, 1)
    # bf16 operands (and bf16 elementwise on v6e/v7x) -> loosened tolerance vs f32 ref.
    assert jnp.allclose(out_small, ref_small, atol=3e-2, rtol=3e-2), \
        float(jnp.max(jnp.abs(out_small - ref_small)))

    # Larger batch exercising a 2-step grid (megacore path) and a partial last tile.
    x_big = jax.random.normal(k_x2, (200, 1), jnp.float32)
    out_big = jax.block_until_ready(
        linear_regression_forward(x_big, kernel_params, **cfg))
    ref_big = reference_forward(x_big, params)
    assert out_big.shape == (200, 1)
    assert jnp.allclose(out_big, ref_big, atol=3e-2, rtol=3e-2), \
        float(jnp.max(jnp.abs(out_big - ref_big)))

    print("KERNEL_OK")
</pallas_src>

<mosaic_0001>
module attributes {stable_mosaic.version = 11 : i64} {
  func.func @mlp_kernel(%arg0: i32, %arg1: memref<8x1xf32, #tpu.memory_space<vmem>>, %arg2: memref<1x256xf32, #tpu.memory_space<vmem>>, %arg3: memref<1x256xf32, #tpu.memory_space<vmem>>, %arg4: memref<256x384xbf16, #tpu.memory_space<vmem>>, %arg5: memref<1x384xf32, #tpu.memory_space<vmem>>, %arg6: memref<1x384xf32, #tpu.memory_space<vmem>>, %arg7: memref<1xf32, #tpu.memory_space<smem>>, %arg8: memref<8x1xf32, #tpu.memory_space<vmem>>) attributes {dimension_semantics = [#tpu.dimension_semantics<parallel>], iteration_bounds = array<i64: 1>, scalar_prefetch = 0 : i64, scratch_operands = 0 : i64, tpu.core_type = #tpu.core_type<tc>, window_params = [{transform_indices = @transform_0, window_bounds = array<i64: 8, 1>}, {pipeline_mode = #tpu.pipeline_mode<synchronous>, transform_indices = @transform_1, window_bounds = array<i64: 1, 256>}, {pipeline_mode = #tpu.pipeline_mode<synchronous>, transform_indices = @transform_2, window_bounds = array<i64: 1, 256>}, {pipeline_mode = #tpu.pipeline_mode<synchronous>, transform_indices = @transform_3, window_bounds = array<i64: 256, 384>}, {pipeline_mode = #tpu.pipeline_mode<synchronous>, transform_indices = @transform_4, window_bounds = array<i64: 1, 384>}, {pipeline_mode = #tpu.pipeline_mode<synchronous>, transform_indices = @transform_5, window_bounds = array<i64: 1, 384>}, {transform_indices = @transform_6, window_bounds = array<i64: 1>}, {transform_indices = @transform_7, window_bounds = array<i64: 8, 1>}]} {
    %c0 = arith.constant 0 : index
    %c0_0 = arith.constant 0 : index
    %0 = vector.load %arg1[%c0, %c0_0] : memref<8x1xf32, #tpu.memory_space<vmem>>, vector<8x1xf32>
    %c0_1 = arith.constant 0 : index
    %c0_2 = arith.constant 0 : index
    %1 = vector.load %arg2[%c0_1, %c0_2] : memref<1x256xf32, #tpu.memory_space<vmem>>, vector<1x256xf32>
    %2 = vector.broadcast %0 : vector<8x1xf32> to vector<8x256xf32>
    %3 = vector.broadcast %1 : vector<1x256xf32> to vector<8x256xf32>
    %4 = arith.mulf %2, %3 : vector<8x256xf32>
    %c0_3 = arith.constant 0 : index
    %c0_4 = arith.constant 0 : index
    %5 = vector.load %arg3[%c0_3, %c0_4] : memref<1x256xf32, #tpu.memory_space<vmem>>, vector<1x256xf32>
    %6 = vector.broadcast %5 : vector<1x256xf32> to vector<8x256xf32>
    %7 = arith.addf %4, %6 : vector<8x256xf32>
    %8 = math.tanh %7 : vector<8x256xf32>
    %9 = arith.truncf %8 : vector<8x256xf32> to vector<8x256xbf16>
    %c0_5 = arith.constant 0 : index
    %c0_6 = arith.constant 0 : index
    %10 = vector.load %arg4[%c0_5, %c0_6] : memref<256x384xbf16, #tpu.memory_space<vmem>>, vector<256x384xbf16>
    %cst = arith.constant dense<0.000000e+00> : vector<8x384xf32>
    %11 = tpu.matmul %9, %10, %cst {dimension_numbers = #tpu.dot_dimension_numbers<[1], [0], [0], [1], [0, 0, 1, 1], [], []>} : vector<8x256xbf16>, vector<256x384xbf16>, vector<8x384xf32> -> vector<8x384xf32>
    %c0_7 = arith.constant 0 : index
    %c0_8 = arith.constant 0 : index
    %12 = vector.load %arg5[%c0_7, %c0_8] : memref<1x384xf32, #tpu.memory_space<vmem>>, vector<1x384xf32>
    %13 = vector.broadcast %12 : vector<1x384xf32> to vector<8x384xf32>
    %14 = arith.addf %11, %13 : vector<8x384xf32>
    %cst_9 = arith.constant 0.000000e+00 : f32
    %15 = vector.broadcast %cst_9 : f32 to vector<8x384xf32>
    %16 = arith.maximumf %14, %15 : vector<8x384xf32>
    %c0_10 = arith.constant 0 : index
    %c0_11 = arith.constant 0 : index
    %17 = vector.load %arg6[%c0_10, %c0_11] : memref<1x384xf32, #tpu.memory_space<vmem>>, vector<1x384xf32>
    %18 = vector.broadcast %17 : vector<1x384xf32> to vector<8x384xf32>
    %19 = arith.mulf %16, %18 : vector<8x384xf32>
    %20 = vector.extract_strided_slice %19 {offsets = [0, 0], sizes = [8, 128], strides = [1, 1]} : vector<8x384xf32> to vector<8x128xf32>
    %21 = vector.extract_strided_slice %19 {offsets = [0, 128], sizes = [8, 128], strides = [1, 1]} : vector<8x384xf32> to vector<8x128xf32>
    %22 = arith.addf %20, %21 : vector<8x128xf32>
    %23 = vector.extract_strided_slice %19 {offsets = [0, 256], sizes = [8, 128], strides = [1, 1]} : vector<8x384xf32> to vector<8x128xf32>
    %24 = arith.addf %22, %23 : vector<8x128xf32>
    %cst_12 = arith.constant dense<0.000000e+00> : vector<8xf32>
    %25 = vector.multi_reduction <add>, %24, %cst_12 [1] : vector<8x128xf32> to vector<8xf32>
    %26 = vector.shape_cast %25 : vector<8xf32> to vector<8x1xf32>
    %c0_13 = arith.constant 0 : index
    %27 = memref.load %arg7[%c0_13] : memref<1xf32, #tpu.memory_space<smem>>
    %28 = vector.broadcast %27 : f32 to vector<8x1xf32>
    %29 = arith.addf %26, %28 : vector<8x1xf32>
    %c0_14 = arith.constant 0 : index
    %c0_15 = arith.constant 0 : index
    %30 = vector.load %arg8[%c0_14, %c0_15] : memref<8x1xf32, #tpu.memory_space<vmem>>, vector<8x1xf32>
    tpu.vector_store %arg8[%c0_14, %c0_15], %29 {strides = array<i32>} : memref<8x1xf32, #tpu.memory_space<vmem>>, vector<8x1xf32>,
    return
  }
  func.func @transform_0(%arg0: i32) -> (i32, i32) {
    %c0_i32 = arith.constant 0 : i32
    %c0_i32_0 = arith.constant 0 : i32
    return %arg0, %c0_i32 : i32, i32
  }
  func.func @transform_1(%arg0: i32) -> (i32, i32) {
    %c0_i32 = arith.constant 0 : i32
    %c0_i32_0 = arith.constant 0 : i32
    %c0_i32_1 = arith.constant 0 : i32
    return %c0_i32, %c0_i32_0 : i32, i32
  }
  func.func @transform_2(%arg0: i32) -> (i32, i32) {
    %c0_i32 = arith.constant 0 : i32
    %c0_i32_0 = arith.constant 0 : i32
    %c0_i32_1 = arith.constant 0 : i32
    return %c0_i32, %c0_i32_0 : i32, i32
  }
  func.func @transform_3(%arg0: i32) -> (i32, i32) {
    %c0_i32 = arith.constant 0 : i32
    %c0_i32_0 = arith.constant 0 : i32
    %c0_i32_1 = arith.constant 0 : i32
    return %c0_i32, %c0_i32_0 : i32, i32
  }
  func.func @transform_4(%arg0: i32) -> (i32, i32) {
    %c0_i32 = arith.constant 0 : i32
    %c0_i32_0 = arith.constant 0 : i32
    %c0_i32_1 = arith.constant 0 : i32
    return %c0_i32, %c0_i32_0 : i32, i32
  }
  func.func @transform_5(%arg0: i32) -> (i32, i32) {
    %c0_i32 = arith.constant 0 : i32
    %c0_i32_0 = arith.constant 0 : i32
    %c0_i32_1 = arith.constant 0 : i32
    return %c0_i32, %c0_i32_0 : i32, i32
  }
  func.func @transform_6(%arg0: i32) -> i32 {
    %c0_i32 = arith.constant 0 : i32
    %c0_i32_0 = arith.constant 0 : i32
    return %c0_i32 : i32
  }
  func.func @transform_7(%arg0: i32) -> (i32, i32) {
    %c0_i32 = arith.constant 0 : i32
    %c0_i32_0 = arith.constant 0 : i32
    return %arg0, %c0_i32 : i32, i32
  }
}

</mosaic_0001>

<bundles_post_ra>
// kernel: tpu_custom_call.1
= control target key start
LH: loop header
LB: loop body
LE: loop exit
PB: predicated region body
PF: predicated region fallthrough
CT: control target
= control target key end

     0   :  { %13 = vsyncpa [#allocation4], 0  ;;  %s702_s24 = smov [#allocation3]   ;;  %s779_s0 = inlined_call_operand.vmem [shape: f32[8,1], index: 0, kind: input, shape index: {}]   ;;  %s780_s1 = inlined_call_operand.vmem [shape: f32[1,256], index: 1, kind: input, shape index: {}]   ;;  %s781_s2 = inlined_call_operand.vmem [shape: f32[1,256], index: 2, kind: input, shape index: {}]   ;;  %s782_s3 = inlined_call_operand.hbm [shape: bf16[256,384], index: 3, kind: input, shape index: {}]   ;;  %s783_s4 = inlined_call_operand.vmem [shape: f32[1,384], index: 4, kind: input, shape index: {}]   ;;  %s784_s5 = inlined_call_operand.vmem [shape: f32[1,384], index: 5, kind: input, shape index: {}]   ;;  %s785_s6 = inlined_call_operand.<no memory space> [shape: f32[1], index: 6, kind: input, shape index: {}]   ;;  %s786_s7 = inlined_call_operand.vmem [shape: f32[8,1], index: 7, kind: output, shape index: {}]  }
   0x1   :  { %s25_s25 = sshll.u32 %s702_s24, 4  ;;  %s678_s28 = scalar_lea.hbm %s782_s3, 6144  ;;  %s26_s25 = int_to_ptr.vmem [resolvable:$true] %s25_s25 }
   0x2   :  { %p679_p0 = scmp.ne.s32.totalorder %s782_s3, %s678_s28  ;;  %p682_p1 = scmp.lt.u32.totalorder %s678_s28, %s782_s3 }
   0x4   :  { %p684_p2 = pnand %p682_p1, %p679_p0 }
   0x6   :  { %687 = shalt.err (!%p684_p2)
}
   0x7   :  { %s688_s10 = scalar_lea.vmem %s26_s25, 6144  ;;  %p693_p4 = scmp.lt.s32.totalorder %s26_s25, %s26_s25 }
   0x8   :  { %p689_p3 = scmp.ne.s32.totalorder %s26_s25, %s688_s10  ;;  %p694_p5 = scmp.lt.s32.totalorder %s688_s10, %s688_s10 }
   0xa   :  { %p695_p6 = por %p694_p5, %p693_p4 }
   0xc   :  { %p696_p7 = pnand %p695_p6, %p689_p3 }
   0xe   :  { %699 = shalt.err (!%p696_p7)
}
   0xf   :  { %s703_s11 = smov 192   ;;  %s704_s12 = smov 12  }
  0x10   :  { %31 = dma.hbm_to_vmem [thread:$0]  %s782_s3, 6144, %s26_s25, [#allocation4], %s703_s11, %s703_s11, %s704_s12  }
  0x11   :  { %700 = dma.done.wait [#allocation4], 6144  }
  0x12   :  { %701 = vsyncadd [#allocation4], 4294961152  ;;  %v705_v0 = vmov 0   ;;  %v42_v1 = vld [vmem:[%s779_s0] sm:$0xff]  ;;  %v613_v4 = vld [vmem:[#allocation3 + $0x1c] ss:$12 sps:$4 sm:$0xff]   ;;  %v50_v50 = vlaneseq }
  0x13   :  { %609 = vset.pattern.permute.xlu0 %v705_v0  ;;  %v610_v2 = vld [vmem:[#allocation3 + $0x4] ss:$12 sps:$4 sm:$0xff]   ;;  %v612_v3 = vld [vmem:[#allocation3] ss:$12 sps:$4 sm:$0xff]   ;;  %v621_v9 = vld [vmem:[#allocation3 + $0x48] ss:$12 sps:$4 sm:$0xff]  }
  0x14   :  { %46 = vperm.xlu0 %609, %v42_v1   ;;  %417 = vmatprep.subr.bf16.mxu0 %v610_v2  ;;  %v615_v5 = vld [vmem:[#allocation3 + $0x18] ss:$12 sps:$4 sm:$0xff]   ;;  %v616_v6 = vld [vmem:[#allocation3 + $0x34] ss:$12 sps:$4 sm:$0xff]   ;;  %v618_v7 = vld [vmem:[#allocation3 + $0x30] ss:$12 sps:$4 sm:$0xff]  }
  0x15   :  { %418 = vmatpush1.bf16.msra.mxu0 %v612_v3  ;;  %v619_v8 = vld [vmem:[#allocation3 + $0x4c] ss:$12 sps:$4 sm:$0xff]   ;;  %v636_v10 = vld [vmem:[#allocation3 + $0xc8] ss:$12 sps:$4 sm:$0xff]   ;;  %v622_v11 = vld [vmem:[#allocation3 + $0x64] ss:$12 sps:$4 sm:$0xff]  }
  0x16   :  { %419 = vmatprep.subr.bf16.mxu0 %v613_v4  ;;  %583 = vmatprep.subr.bf16.mxu1 %v636_v10  ;;  %v638_v12 = vld [vmem:[#allocation3 + $0x8] ss:$12 sps:$4 sm:$0xff]   ;;  %v624_v13 = vld [vmem:[#allocation3 + $0x60] ss:$12 sps:$4 sm:$0xff]   ;;  %v627_v17 = vld [vmem:[#allocation3 + $0x78] ss:$12 sps:$4 sm:$0xff]  }
  0x17   :  { %v625_v14 = vld [vmem:[#allocation3 + $0x7c] ss:$12 sps:$4 sm:$0xff]   ;;  %584 = vmatpush3.bf16.msra.mxu1 %v638_v12  ;;  %v641_v15 = vld [vmem:[#allocation3 + $0xe0] ss:$12 sps:$4 sm:$0xff]   ;;  %v646_v18 = vld [vmem:[#allocation3 + $0xf8] ss:$12 sps:$4 sm:$0xff]  }
  0x18   :  { %v643_v16 = vld [vmem:[#allocation3 + $0x20] ss:$12 sps:$4 sm:$0xff]   ;;  %585 = vmatprep.subr.bf16.mxu1 %v641_v15  ;;  %v648_v19 = vld [vmem:[#allocation3 + $0x38] ss:$12 sps:$4 sm:$0xff]   ;;  %v651_v21 = vld [vmem:[#allocation3 + $0x110] ss:$12 sps:$4 sm:$0xff]  }
  0x19   :  { %420 = vmatpush1.bf16.msra.mxu0 %v615_v5  ;;  %v628_v20 = vld [vmem:[#allocation3 + $0x94] ss:$12 sps:$4 sm:$0xff]   ;;  %v630_v22 = vld [vmem:[#allocation3 + $0x90] ss:$12 sps:$4 sm:$0xff]   ;;  %v631_v24 = vld [vmem:[#allocation3 + $0xac] ss:$12 sps:$4 sm:$0xff]  }
  0x1a   :  { %421 = vmatprep.subr.bf16.mxu0 %v616_v6  ;;  %v653_v23 = vld [vmem:[#allocation3 + $0x50] ss:$12 sps:$4 sm:$0xff]   ;;  %v656_v25 = vld [vmem:[#allocation3 + $0x128] ss:$12 sps:$4 sm:$0xff]   ;;  %v661_v29 = vld [vmem:[#allocation3 + $0x140] ss:$12 sps:$4 sm:$0xff]  }
  0x1b   :  { %586 = vmatpush3.bf16.msra.mxu1 %v643_v16  ;;  %v633_v26 = vld [vmem:[#allocation3 + $0xa8] ss:$12 sps:$4 sm:$0xff]   ;;  %v634_v28 = vld [vmem:[#allocation3 + $0xc4] ss:$12 sps:$4 sm:$0xff]   ;;  %v637_v30 = vld [vmem:[#allocation3 + $0xc0] ss:$12 sps:$4 sm:$0xff]  }
  0x1c   :  { %587 = vmatprep.subr.bf16.mxu1 %v646_v18  ;;  %v658_v27 = vld [vmem:[#allocation3 + $0x68] ss:$12 sps:$4 sm:$0xff]   ;;  %v663_v31 = vld [vmem:[#allocation3 + $0x80] ss:$12 sps:$4 sm:$0xff]   ;;  %v666_v33 = vld [vmem:[#allocation3 + $0x158] ss:$12 sps:$4 sm:$0xff]  }
  0x1d   :  { %422 = vmatpush1.bf16.msra.mxu0 %v618_v7  ;;  %v639_v32 = vld [vmem:[#allocation3 + $0xdc] ss:$12 sps:$4 sm:$0xff]   ;;  %v642_v34 = vld [vmem:[#allocation3 + $0xd8] ss:$12 sps:$4 sm:$0xff]   ;;  %v644_v35 = vld [vmem:[#allocation3 + $0xf4] ss:$12 sps:$4 sm:$0xff]  }
  0x1e   :  { %423 = vmatprep.subr.bf16.mxu0 %v619_v8  ;;  %v668_v36 = vld [vmem:[#allocation3 + $0x98] ss:$12 sps:$4 sm:$0xff]   ;;  %v671_v37 = vld [vmem:[#allocation3 + $0x170] ss:$12 sps:$4 sm:$0xff]   ;;  %v652_v41 = vld [vmem:[#allocation3 + $0x108] ss:$12 sps:$4 sm:$0xff]  }
  0x1f   :  { %588 = vmatpush3.bf16.msra.mxu1 %v648_v19  ;;  %v647_v38 = vld [vmem:[#allocation3 + $0xf0] ss:$12 sps:$4 sm:$0xff]   ;;  %v649_v40 = vld [vmem:[#allocation3 + $0x10c] ss:$12 sps:$4 sm:$0xff]   ;;  %v664_v46 = vld [vmem:[#allocation3 + $0x154] ss:$12 sps:$4 sm:$0xff]  }
  0x20   :  { %589 = vmatprep.subr.bf16.mxu1 %v651_v21  ;;  %v673_v39 = vld [vmem:[#allocation3 + $0xb0] ss:$12 sps:$4 sm:$0xff]   ;;  %v657_v43 = vld [vmem:[#allocation3 + $0x120] ss:$12 sps:$4 sm:$0xff]   ;;  %v662_v45 = vld [vmem:[#allocation3 + $0x138] ss:$12 sps:$4 sm:$0xff]  }
  0x21   :  { %424 = vmatpush1.bf16.msra.mxu0 %v621_v9  ;;  %v654_v42 = vld [vmem:[#allocation3 + $0x124] ss:$12 sps:$4 sm:$0xff]   ;;  %v659_v44 = vld [vmem:[#allocation3 + $0x13c] ss:$12 sps:$4 sm:$0xff]   ;;  %v669_v48 = vld [vmem:[#allocation3 + $0x16c] ss:$12 sps:$4 sm:$0xff]  }
  0x22   :  { %425 = vmatprep.subr.bf16.mxu0 %v622_v11  ;;  %v667_v47 = vld [vmem:[#allocation3 + $0x150] ss:$12 sps:$4 sm:$0xff]   ;;  %v672_v49 = vld [vmem:[#allocation3 + $0x168] ss:$12 sps:$4 sm:$0xff]   ;;  %v51_v51 = vshrl.u32 %v50_v50, 7  ;;  %vm528_vm0 = vcmask 7168  }
  0x23   :  { %590 = vmatpush3.bf16.msra.mxu1 %v653_v23  ;;  %v43_v54 = vld [vmem:[%s780_s1] sm:$0x3] }
  0x24   :  { %591 = vmatprep.subr.bf16.mxu1 %v656_v25  ;;  %v52_v52 = vsub.s32 0, %v51_v51  ;;  %v56_v53 = vsub.s32 1, %v51_v51  ;;  %v62_v55 = vld [vmem:[%s781_s2] sm:$0x3]  ;;  %v156_v6 = vsub.s32 2, %v51_v51 }
  0x25   :  { %426 = vmatpush1.bf16.msra.mxu0 %v624_v13  ;;  %v144_v5 = vld [vmem:[%s783_s4] sm:$0x7] }
  0x26   :  { %427 = vmatprep.subr.bf16.mxu0 %v625_v14  ;;  %v53_v56 = vrot.slane %v43_v54, %v52_v52  ;;  %v57_v57 = vrot.slane %v43_v54, %v56_v53  ;;  %v67_v58 = vrot.slane %v62_v55, %v52_v52  ;;  %v71_v59 = vrot.slane %v62_v55, %v56_v53  ;;  %v501_v8 = vld [vmem:[%s784_s5] sm:$0x7] }
  0x27   :  { %592 = vmatpush3.bf16.msra.mxu1 %v658_v27  ;;  %v149_v7 = vrot.slane %v144_v5, %v52_v52  ;;  %v153_v9 = vrot.slane %v144_v5, %v56_v53  ;;  %v157_v12 = vrot.slane %v144_v5, %v156_v6  ;;  %v506_v14 = vrot.slane %v501_v8, %v52_v52 }
  0x28   :  { %593 = vmatprep.subr.bf16.mxu1 %v661_v29  ;;  %v510_v18 = vrot.slane %v501_v8, %v56_v53  ;;  %v514_v27 = vrot.slane %v501_v8, %v156_v6 }
  0x29   :  { %428 = vmatpush1.bf16.msra.mxu0 %v627_v17 }
  0x2a   :  { %429 = vmatprep.subr.bf16.mxu0 %v628_v20 }
  0x2b   :  { %594 = vmatpush3.bf16.msra.mxu1 %v663_v31 }
  0x2c   :  { %595 = vmatprep.subr.bf16.mxu1 %v666_v33 }
  0x2d   :  { %430 = vmatpush1.bf16.msra.mxu0 %v630_v22 }
  0x2e   :  { %431 = vmatprep.subr.bf16.mxu0 %v631_v24 }
  0x2f   :  { %596 = vmatpush3.bf16.msra.mxu1 %v668_v36 }
  0x30   :  { %597 = vmatprep.subr.bf16.mxu1 %v671_v37 }
  0x31   :  { %432 = vmatpush1.bf16.msra.mxu0 %v633_v26 }
  0x32   :  { %433 = vmatprep.subr.bf16.mxu0 %v634_v28 }
  0x33   :  { %598 = vmatpush3.bf16.msra.mxu1 %v673_v39 }
  0x35   :  { %434 = vmatpush1.bf16.msra.mxu0 %v637_v30 }
  0x36   :  { %435 = vmatprep.subr.bf16.mxu0 %v639_v32 }
  0x39   :  { %436 = vmatpush1.bf16.msra.mxu0 %v642_v34  ;;  %v526_v34 = vstv %s785_s6 }
  0x3a   :  { %437 = vmatprep.subr.bf16.mxu0 %v644_v35 }
  0x3d   :  { %438 = vmatpush1.bf16.msra.mxu0 %v647_v38 }
  0x3e   :  { %439 = vmatprep.subr.bf16.mxu0 %v649_v40 }
  0x41   :  { %440 = vmatpush1.bf16.msra.mxu0 %v652_v41 }
  0x42   :  { %441 = vmatprep.subr.bf16.mxu0 %v654_v42 }
  0x45   :  { %442 = vmatpush1.bf16.msra.mxu0 %v657_v43 }
  0x46   :  { %443 = vmatprep.subr.bf16.mxu0 %v659_v44 }
  0x49   :  { %444 = vmatpush1.bf16.msra.mxu0 %v662_v45 }
  0x4a   :  { %445 = vmatprep.subr.bf16.mxu0 %v664_v46 }
  0x4d   :  { %446 = vmatpush1.bf16.msra.mxu0 %v667_v47 }
  0x4e   :  { %447 = vmatprep.subr.bf16.mxu0 %v669_v48 }
  0x51   :  { %448 = vmatpush1.bf16.msra.mxu0 %v672_v49 }
  0x93   :  { %v47_v60 = vpop.permute.xlu0 %46 }
  0x94   :  { %v60_v61 = vmul.f32 %v53_v56, %v47_v60  ;;  %v61_v62 = vmul.f32 %v57_v57, %v47_v60 }
  0x96   :  { %v74_v63 = vadd.f32 %v67_v58, %v60_v61  ;;  %v75_v0 = vadd.f32 %v71_v59, %v61_v62 }
  0x98   :  { %674 = vtanh.f32 %v74_v63 }
  0x99   :  { %676 = vtanh.f32 %v75_v0 }
  0xa2   :  { %v675_v1 = vpop.eup %674 }
  0xa3   :  { %v677_v2 = vpop.eup %676  ;;  %v78_v3 = vpack.c.bf16 %v675_v1, %v675_v1 }
  0xa4   :  { %v79_v4 = vpack.c.bf16 %v677_v2, %v677_v2 }
  0xa6   :  { %449 = vmatprep.mubr.bf16.mxu0 %v79_v4  ;;  %490 = vmatprep.mubr.bf16.mxu1 %v79_v4 }
  0xa7   :  { %450 = vmatmul.mubr.bf16.vlgmr.msra.gmra.mrb[0].mxu0 %v78_v3  ;;  %491 = vmatmul.mubr.bf16.vlgmr.msra.gmra.mrb[0].mxu1 %v78_v3 }
 0x17a   :  { %v451_v10 = vpop.f32.mrb[0].mxu0  ;;  %v599_v11 = vpop.f32.mrb[0].mxu1 }
 0x17b   :  { %v452_v13 = vadd.f32 %v451_v10, %v149_v7  ;;  %v453_v15 = vpop.f32.mrb[1].mxu0  ;;  %v600_v16 = vpop.f32.mrb[1].mxu1 }
 0x17c   :  { %v454_v17 = vadd.f32 %v453_v15, %v153_v9  ;;  %v601_v19 = vadd.f32 %v600_v16, %v599_v11  ;;  %v455_v20 = vpop.f32.mrb[2].mxu0  ;;  %v602_v21 = vpop.f32.mrb[2].mxu1 }
 0x17d   :  { %v498_v22 = vmax.f32 %v452_v13, 0.0  ;;  %v456_v23 = vpop.f32.mrb[3].mxu0  ;;  %v603_v24 = vpop.f32.mrb[3].mxu1 }
 0x17e   :  { %v499_v25 = vmax.f32 %v454_v17, 0.0  ;;  %v493_v26 = vadd.f32 %v601_v19, %v157_v12 }
 0x17f   :  { %v518_v28 = vmul.f32 %v506_v14, %v498_v22 }
 0x180   :  { %v519_v29 = vmul.f32 %v510_v18, %v499_v25  ;;  %v500_v30 = vmax.f32 %v493_v26, 0.0 }
 0x182   :  { %v520_v31 = vmul.f32 %v514_v27, %v500_v30  ;;  %v521_v32 = vadd.f32 %v519_v29, %v518_v28 }
 0x184   :  { %v522_v33 = vadd.f32 %v521_v32, %v520_v31 }
 0x186   :  { %523 = vadd.xlane.f32.xlu0 %v522_v33 }
 0x213   :  { %v524_v35 = vpop.xlane.xlu0 %523 }
 0x214   :  { %v527_v36 = vadd.f32 %v526_v34, %v524_v35 }
 0x216   :  { %529 = vst.msk [vmem:[%s786_s7] sm:$0xff] %vm528_vm0, %v527_v36 }
 0x217   :  { %534 = vsyncpa [#allocation4], 1 }

</bundles_post_ra>
